<compile_context>
chip_gen: v5e
topology: v5e:2x2
jax: 0.10.0
libtpu: 0.0.40
codegen_flags: <defaults>
</compile_context>

<pallas_src>
import math
import functools

import jax
import jax.numpy as jnp
from jax import lax
from jax.experimental import pallas as pl
from jax.experimental.pallas import tpu as pltpu

# ---------------- config (small, consistent with the module) ----------------
N_EMBD = 32      # cfg.n_embd
N_HEAD = 4       # cfg.n_head
N_CTX = 8        # n_ctx (sequence length)
LN_EPS = 1e-5    # OpenAI-style LayerNorm (eps inside the sqrt)
# cfg.afn == 'gelu'


def _gelu(x):
    return 0.5 * x * (1.0 + jnp.tanh(math.sqrt(2.0 / math.pi)
                                     * (x + 0.044715 * x * x * x)))


def _layernorm(x, g, b, eps=LN_EPS):
    u = jnp.mean(x, axis=-1, keepdims=True)
    s = jnp.mean((x - u) ** 2, axis=-1, keepdims=True)
    return g * ((x - u) / jnp.sqrt(s + eps)) + b


# ----------------------------- fused block kernel ---------------------------
def block_kernel(h_ref, w_ref, wmp_ref, bias_ref, out_ref,
                 *, B, T, D, n_head, scale):
    dh = D // n_head
    BT = B * T

    h2d = h_ref[...]                                    # (BT, D), f32

    # lane-dense weight slab: [w_attn (D,3D) | w_proj (D,D) | w_fc (D,4D)]
    w_attn = w_ref[:, :3 * D]
    w_proj = w_ref[:, 3 * D:4 * D]
    w_fc = w_ref[:, 4 * D:8 * D]

    # packed bias / LN-param slab, one row each (padded to 128 lanes)
    b_attn = bias_ref[0:1, :3 * D]
    b_proj = bias_ref[1:2, :D]
    g1 = bias_ref[2:3, :D]
    b1 = bias_ref[3:4, :D]
    b_fc = bias_ref[4:5, :4 * D]
    b_mp = bias_ref[5:6, :D]
    g2 = bias_ref[6:7, :D]
    b2 = bias_ref[7:8, :D]

    # --- fused QKV projection: one lane-dense MXU matmul ---------------------
    qkv = jnp.dot(h2d, w_attn, preferred_element_type=jnp.float32) + b_attn
    kv = qkv[:, D:]                                     # (BT, 2D) cache slab
    q = qkv[:, :D]
    k = qkv[:, D:2 * D]
    v = qkv[:, 2 * D:]

    # --- head split: lane slices stacked on a new leading (head) axis -------
    def split_heads(x2d):
        return jnp.stack([x2d[:, h * dh:(h + 1) * dh] for h in range(n_head)],
                         axis=0)                        # (nh, BT, dh)

    qh = split_heads(q)
    kh = split_heads(k)
    vh = split_heads(v)

    # --- head-batched causal attention over the flat (BT, BT) token grid ----
    s = jnp.einsum('hqd,hkd->hqk', qh, kh, preferred_element_type=jnp.float32)
    if scale:
        s = s * (1.0 / math.sqrt(dh))

    # block-diagonal causal mask: same batch block AND key <= query
    row = lax.broadcasted_iota(jnp.int32, (1, BT, BT), 1)
    col = lax.broadcasted_iota(jnp.int32, (1, BT, BT), 2)
    if (T & (T - 1)) == 0:                              # power-of-two seq len
        shift = T.bit_length() - 1
        same_b = (row >> shift) == (col >> shift)
    else:
        same_b = (row // T) == (col // T)
    mask = jnp.logical_and(same_b, col <= row)
    s = jnp.where(mask, s, -1e9)

    s = s - jnp.max(s, axis=-1, keepdims=True)
    p = jnp.exp(s)
    p = p * pl.reciprocal(jnp.sum(p, axis=-1, keepdims=True), approx=True)

    a = jnp.einsum('hqk,hkd->hqd', p, vh,
                   preferred_element_type=jnp.float32)  # (nh, BT, dh)

    # --- merge_heads (lane concat) + c_proj: one lane-dense matmul ----------
    a_m = jnp.concatenate([a[h] for h in range(n_head)], axis=1)   # (BT, D)
    attn = jnp.dot(a_m, w_proj, preferred_element_type=jnp.float32) + b_proj

    # --- residual + LN1, MLP (gelu), residual + LN2 --------------------------
    n = _layernorm(h2d + attn, g1, b1)
    m = jnp.dot(n, w_fc, preferred_element_type=jnp.float32) + b_fc
    m = _gelu(m)
    m = jnp.dot(m, wmp_ref[...], preferred_element_type=jnp.float32) + b_mp
    hout = _layernorm(n + m, g2, b2)

    # single lane-dense output slab: [h_out | k | v]
    out_ref[...] = jnp.concatenate([hout, kv], axis=1)


# ----------------------------- parameter prep --------------------------------
def prepare_block_params(raw):
    """Pack the 19 small parameters into 3 lane-dense slabs (one-time cost)."""
    D = raw['w_attn'].shape[0]
    bw = ((max(3 * D, 4 * D, 128) + 127) // 128) * 128

    def pad(v):
        return jnp.pad(v.astype(jnp.float32), (0, bw - v.shape[0]))

    w_slab = jnp.concatenate([raw['w_attn'], raw['w_proj'], raw['w_fc']],
                             axis=1).astype(jnp.float32)          # (D, 8D)
    bias_slab = jnp.stack([pad(raw['b_attn']), pad(raw['b_proj']),
                           pad(raw['g1']), pad(raw['b1']),
                           pad(raw['b_fc']), pad(raw['b_mp']),
                           pad(raw['g2']), pad(raw['b2'])], axis=0)  # (8, bw)
    return {'w_slab': w_slab,
            'w_mp': raw['w_mp'].astype(jnp.float32),               # (4D, D)
            'bias_slab': bias_slab}


# ----------------------------- Block forward ---------------------------------
def block_forward(params, x, scale=True, n_head=N_HEAD):
    """x: (B, T, D) float. Returns (h, key, value) like Block.forward()."""
    # TODO(synk): incremental-decoding path (pre_h / pre_key / pre_value) not
    # implemented; only the full-sequence (pre_* = None) forward is covered.
    B, T, D = x.shape
    dh = D // n_head
    h2d = x.reshape(B * T, D).astype(jnp.float32)       # canonical 2-D layout

    kernel = functools.partial(block_kernel, B=B, T=T, D=D,
                               n_head=n_head, scale=scale)
    out = pl.pallas_call(
        kernel,
        out_shape=jax.ShapeDtypeStruct((B * T, 3 * D), jnp.float32),
        in_specs=[pl.BlockSpec(memory_space=pltpu.MemorySpace.VMEM)] * 4,
        out_specs=pl.BlockSpec(memory_space=pltpu.MemorySpace.VMEM),
    )(h2d, params['w_slab'], params['w_mp'], params['bias_slab'])

    h_out = out[:, :D].reshape(B, T, D)
    k2 = out[:, D:2 * D].reshape(B, T, n_head, dh)
    v2 = out[:, 2 * D:].reshape(B, T, n_head, dh)
    key = jnp.transpose(k2, (0, 2, 3, 1))    # (B, nh, dh, T) == split_heads(k=True)
    value = jnp.transpose(v2, (0, 2, 1, 3))  # (B, nh, T, dh)
    return h_out, key, value


# ----------------------------- pure-JAX reference ----------------------------
def block_reference(raw, x, scale=True, n_head=N_HEAD):
    B, T, D = x.shape
    dh = D // n_head
    h2d = x.reshape(B * T, D)
    qkv = h2d @ raw['w_attn'] + raw['b_attn']
    qkv = qkv.reshape(B, T, 3 * D)
    q, k, v = qkv[..., :D], qkv[..., D:2 * D], qkv[..., 2 * D:]
    q = jnp.transpose(q.reshape(B, T, n_head, dh), (0, 2, 1, 3))
    kT = jnp.transpose(k.reshape(B, T, n_head, dh), (0, 2, 3, 1))
    v = jnp.transpose(v.reshape(B, T, n_head, dh), (0, 2, 1, 3))
    w = jnp.einsum('bhqd,bhdk->bhqk', q, kT)
    if scale:
        w = w / math.sqrt(dh)
    mask = jnp.tril(jnp.ones((T, T), jnp.float32))
    w = w * mask + (-1e9) * (1.0 - mask)
    w = jax.nn.softmax(w, axis=-1)
    a = jnp.einsum('bhqk,bhkd->bhqd', w, v)
    a = jnp.transpose(a, (0, 2, 1, 3)).reshape(B * T, D)
    a = a @ raw['w_proj'] + raw['b_proj']

    def ln(xx, g, b):
        u = xx.mean(-1, keepdims=True)
        s = ((xx - u) ** 2).mean(-1, keepdims=True)
        return g * (xx - u) / jnp.sqrt(s + LN_EPS) + b

    n = ln(h2d + a, raw['g1'], raw['b1'])
    m = n @ raw['w_fc'] + raw['b_fc']
    m = 0.5 * m * (1.0 + jnp.tanh(math.sqrt(2.0 / math.pi) * (m + 0.044715 * m ** 3)))
    m = m @ raw['w_mp'] + raw['b_mp']
    h = ln(n + m, raw['g2'], raw['b2'])
    return h.reshape(B, T, D), kT, v


# ----------------------------- main ------------------------------------------
if __name__ == "__main__":
    rng = jax.random.PRNGKey(0)
    kp, kx = jax.random.split(rng)
    ks = jax.random.split(kp, 8)
    D = N_EMBD
    raw = dict(
        w_attn=0.02 * jax.random.normal(ks[0], (D, 3 * D), jnp.float32),
        b_attn=0.01 * jax.random.normal(ks[1], (3 * D,), jnp.float32),
        w_proj=0.02 * jax.random.normal(ks[2], (D, D), jnp.float32),
        b_proj=0.01 * jax.random.normal(ks[3], (D,), jnp.float32),
        g1=jnp.ones((D,), jnp.float32),
        b1=jnp.zeros((D,), jnp.float32),
        w_fc=0.02 * jax.random.normal(ks[4], (D, 4 * D), jnp.float32),
        b_fc=0.01 * jax.random.normal(ks[5], (4 * D,), jnp.float32),
        w_mp=0.02 * jax.random.normal(ks[6], (4 * D, D), jnp.float32),
        b_mp=0.01 * jax.random.normal(ks[7], (D,), jnp.float32),
        g2=jnp.ones((D,), jnp.float32),
        b2=jnp.zeros((D,), jnp.float32),
    )
    params = prepare_block_params(raw)

    B, T = 2, N_CTX
    x = 0.1 * jax.random.normal(kx, (B, T, D), jnp.float32)

    h, key_cache, value_cache = block_forward(params, x, scale=True)
    jax.block_until_ready((h, key_cache, value_cache))

    assert h.shape == (B, T, D), h.shape
    assert key_cache.shape == (B, N_HEAD, D // N_HEAD, T), key_cache.shape
    assert value_cache.shape == (B, N_HEAD, T, D // N_HEAD), value_cache.shape

    h_ref, k_ref, v_ref = block_reference(raw, x, scale=True)
    assert jnp.allclose(h, h_ref, atol=5e-3, rtol=5e-3), \
        float(jnp.max(jnp.abs(h - h_ref)))
    assert jnp.allclose(key_cache, k_ref, atol=5e-3, rtol=5e-3)
    assert jnp.allclose(value_cache, v_ref, atol=5e-3, rtol=5e-3)

    print("KERNEL_OK")
</pallas_src>

<mosaic_0001>
module attributes {stable_mosaic.version = 11 : i64} {
  func.func @block_kernel(%arg0: memref<16x32xf32, #tpu.memory_space<vmem>>, %arg1: memref<32x256xf32, #tpu.memory_space<vmem>>, %arg2: memref<128x32xf32, #tpu.memory_space<vmem>>, %arg3: memref<8x128xf32, #tpu.memory_space<vmem>>, %arg4: memref<16x96xf32, #tpu.memory_space<vmem>>) attributes {dimension_semantics = [], scalar_prefetch = 0 : i64, scratch_operands = 0 : i64, tpu.core_type = #tpu.core_type<tc>} {
    %c0 = arith.constant 0 : index
    %c0_0 = arith.constant 0 : index
    %0 = vector.load %arg0[%c0, %c0_0] : memref<16x32xf32, #tpu.memory_space<vmem>>, vector<16x32xf32>
    %c0_1 = arith.constant 0 : index
    %c0_2 = arith.constant 0 : index
    %1 = vector.load %arg1[%c0_1, %c0_2] : memref<32x256xf32, #tpu.memory_space<vmem>>, vector<32x96xf32>
    %c0_3 = arith.constant 0 : index
    %c96 = arith.constant 96 : index
    %2 = vector.load %arg1[%c0_3, %c96] : memref<32x256xf32, #tpu.memory_space<vmem>>, vector<32x32xf32>
    %c0_4 = arith.constant 0 : index
    %c128 = arith.constant 128 : index
    %3 = vector.load %arg1[%c0_4, %c128] : memref<32x256xf32, #tpu.memory_space<vmem>>, vector<32x128xf32>
    %c0_5 = arith.constant 0 : index
    %c0_6 = arith.constant 0 : index
    %4 = vector.load %arg3[%c0_5, %c0_6] : memref<8x128xf32, #tpu.memory_space<vmem>>, vector<1x96xf32>
    %c1 = arith.constant 1 : index
    %c0_7 = arith.constant 0 : index
    %5 = vector.load %arg3[%c1, %c0_7] : memref<8x128xf32, #tpu.memory_space<vmem>>, vector<1x32xf32>
    %c2 = arith.constant 2 : index
    %c0_8 = arith.constant 0 : index
    %6 = vector.load %arg3[%c2, %c0_8] : memref<8x128xf32, #tpu.memory_space<vmem>>, vector<1x32xf32>
    %c3 = arith.constant 3 : index
    %c0_9 = arith.constant 0 : index
    %7 = vector.load %arg3[%c3, %c0_9] : memref<8x128xf32, #tpu.memory_space<vmem>>, vector<1x32xf32>
    %c4 = arith.constant 4 : index
    %c0_10 = arith.constant 0 : index
    %8 = vector.load %arg3[%c4, %c0_10] : memref<8x128xf32, #tpu.memory_space<vmem>>, vector<1x128xf32>
    %c5 = arith.constant 5 : index
    %c0_11 = arith.constant 0 : index
    %9 = vector.load %arg3[%c5, %c0_11] : memref<8x128xf32, #tpu.memory_space<vmem>>, vector<1x32xf32>
    %c6 = arith.constant 6 : index
    %c0_12 = arith.constant 0 : index
    %10 = vector.load %arg3[%c6, %c0_12] : memref<8x128xf32, #tpu.memory_space<vmem>>, vector<1x32xf32>
    %c7 = arith.constant 7 : index
    %c0_13 = arith.constant 0 : index
    %11 = vector.load %arg3[%c7, %c0_13] : memref<8x128xf32, #tpu.memory_space<vmem>>, vector<1x32xf32>
    %cst = arith.constant dense<0.000000e+00> : vector<16x96xf32>
    %12 = tpu.matmul %0, %1, %cst {dimension_numbers = #tpu.dot_dimension_numbers<[1], [0], [0], [1], [0, 0, 1, 1], [], []>} : vector<16x32xf32>, vector<32x96xf32>, vector<16x96xf32> -> vector<16x96xf32>
    %13 = vector.broadcast %4 : vector<1x96xf32> to vector<16x96xf32>
    %14 = arith.addf %12, %13 : vector<16x96xf32>
    %15 = vector.extract_strided_slice %14 {offsets = [0, 32], sizes = [16, 64], strides = [1, 1]} : vector<16x96xf32> to vector<16x64xf32>
    %16 = vector.extract_strided_slice %14 {offsets = [0, 0], sizes = [16, 32], strides = [1, 1]} : vector<16x96xf32> to vector<16x32xf32>
    %17 = vector.extract_strided_slice %14 {offsets = [0, 32], sizes = [16, 32], strides = [1, 1]} : vector<16x96xf32> to vector<16x32xf32>
    %18 = vector.extract_strided_slice %14 {offsets = [0, 64], sizes = [16, 32], strides = [1, 1]} : vector<16x96xf32> to vector<16x32xf32>
    %19 = vector.extract_strided_slice %16 {offsets = [0, 0], sizes = [16, 8], strides = [1, 1]} : vector<16x32xf32> to vector<16x8xf32>
    %20 = vector.extract_strided_slice %16 {offsets = [0, 8], sizes = [16, 8], strides = [1, 1]} : vector<16x32xf32> to vector<16x8xf32>
    %21 = vector.extract_strided_slice %16 {offsets = [0, 16], sizes = [16, 8], strides = [1, 1]} : vector<16x32xf32> to vector<16x8xf32>
    %22 = vector.extract_strided_slice %16 {offsets = [0, 24], sizes = [16, 8], strides = [1, 1]} : vector<16x32xf32> to vector<16x8xf32>
    %23 = vector.shape_cast %19 : vector<16x8xf32> to vector<1x16x8xf32>
    %24 = vector.shape_cast %20 : vector<16x8xf32> to vector<1x16x8xf32>
    %25 = vector.shape_cast %21 : vector<16x8xf32> to vector<1x16x8xf32>
    %26 = vector.shape_cast %22 : vector<16x8xf32> to vector<1x16x8xf32>
    %27 = tpu.concatenate %23, %24, %25, %26 in 0 : vector<1x16x8xf32>, vector<1x16x8xf32>, vector<1x16x8xf32>, vector<1x16x8xf32> -> vector<4x16x8xf32>
    %28 = vector.extract_strided_slice %17 {offsets = [0, 0], sizes = [16, 8], strides = [1, 1]} : vector<16x32xf32> to vector<16x8xf32>
    %29 = vector.extract_strided_slice %17 {offsets = [0, 8], sizes = [16, 8], strides = [1, 1]} : vector<16x32xf32> to vector<16x8xf32>
    %30 = vector.extract_strided_slice %17 {offsets = [0, 16], sizes = [16, 8], strides = [1, 1]} : vector<16x32xf32> to vector<16x8xf32>
    %31 = vector.extract_strided_slice %17 {offsets = [0, 24], sizes = [16, 8], strides = [1, 1]} : vector<16x32xf32> to vector<16x8xf32>
    %32 = vector.shape_cast %28 : vector<16x8xf32> to vector<1x16x8xf32>
    %33 = vector.shape_cast %29 : vector<16x8xf32> to vector<1x16x8xf32>
    %34 = vector.shape_cast %30 : vector<16x8xf32> to vector<1x16x8xf32>
    %35 = vector.shape_cast %31 : vector<16x8xf32> to vector<1x16x8xf32>
    %36 = tpu.concatenate %32, %33, %34, %35 in 0 : vector<1x16x8xf32>, vector<1x16x8xf32>, vector<1x16x8xf32>, vector<1x16x8xf32> -> vector<4x16x8xf32>
    %37 = vector.extract_strided_slice %18 {offsets = [0, 0], sizes = [16, 8], strides = [1, 1]} : vector<16x32xf32> to vector<16x8xf32>
    %38 = vector.extract_strided_slice %18 {offsets = [0, 8], sizes = [16, 8], strides = [1, 1]} : vector<16x32xf32> to vector<16x8xf32>
    %39 = vector.extract_strided_slice %18 {offsets = [0, 16], sizes = [16, 8], strides = [1, 1]} : vector<16x32xf32> to vector<16x8xf32>
    %40 = vector.extract_strided_slice %18 {offsets = [0, 24], sizes = [16, 8], strides = [1, 1]} : vector<16x32xf32> to vector<16x8xf32>
    %41 = vector.shape_cast %37 : vector<16x8xf32> to vector<1x16x8xf32>
    %42 = vector.shape_cast %38 : vector<16x8xf32> to vector<1x16x8xf32>
    %43 = vector.shape_cast %39 : vector<16x8xf32> to vector<1x16x8xf32>
    %44 = vector.shape_cast %40 : vector<16x8xf32> to vector<1x16x8xf32>
    %45 = tpu.concatenate %41, %42, %43, %44 in 0 : vector<1x16x8xf32>, vector<1x16x8xf32>, vector<1x16x8xf32>, vector<1x16x8xf32> -> vector<4x16x8xf32>
    "tpu.trace_start"() <{level = 10 : i32, message = "hqd,hkd->hqk"}> : () -> ()
    %cst_14 = arith.constant dense<0.000000e+00> : vector<4x16x16xf32>
    %46 = tpu.matmul %27, %36, %cst_14 {dimension_numbers = #tpu.dot_dimension_numbers<[2], [2], [1], [1], [0, 0, 0, 1, 1, 1], [0], [0]>} : vector<4x16x8xf32>, vector<4x16x8xf32>, vector<4x16x16xf32> -> vector<4x16x16xf32>
    "tpu.trace_stop"() : () -> ()
    %cst_15 = arith.constant 0.353553385 : f32
    %47 = vector.broadcast %cst_15 : f32 to vector<4x16x16xf32>
    %48 = arith.mulf %46, %47 : vector<4x16x16xf32>
    %49 = tpu.iota {dimensions = array<i32: 1>} : vector<1x16x16xi32>
    %50 = tpu.iota {dimensions = array<i32: 2>} : vector<1x16x16xi32>
    %c3_i32 = arith.constant 3 : i32
    %51 = vector.broadcast %c3_i32 : i32 to vector<1x16x16xi32>
    %52 = arith.shrsi %49, %51 : vector<1x16x16xi32>
    %c3_i32_16 = arith.constant 3 : i32
    %53 = vector.broadcast %c3_i32_16 : i32 to vector<1x16x16xi32>
    %54 = arith.shrsi %50, %53 : vector<1x16x16xi32>
    %55 = arith.cmpi eq, %52, %54 : vector<1x16x16xi32>
    %56 = arith.cmpi sle, %50, %49 : vector<1x16x16xi32>
    %57 = arith.andi %55, %56 : vector<1x16x16xi1>
    %cst_17 = arith.constant -1.000000e+09 : f32
    %58 = vector.shape_cast %57 : vector<1x16x16xi1> to vector<1x16x16xi1>
    %59 = vector.broadcast %58 : vector<1x16x16xi1> to vector<4x16x16xi1>
    %60 = vector.broadcast %cst_17 : f32 to vector<4x16x16xf32>
    %61 = arith.select %59, %48, %60 : vector<4x16x16xi1>, vector<4x16x16xf32>
    %cst_18 = arith.constant dense<0xFF800000> : vector<4x16xf32>
    %62 = vector.multi_reduction <maximumf>, %61, %cst_18 [2] : vector<4x16x16xf32> to vector<4x16xf32>
    %63 = vector.shape_cast %62 : vector<4x16xf32> to vector<4x16x1xf32>
    %64 = vector.broadcast %63 : vector<4x16x1xf32> to vector<4x16x16xf32>
    %65 = arith.subf %61, %64 : vector<4x16x16xf32>
    %66 = math.exp %65 : vector<4x16x16xf32>
    %cst_19 = arith.constant dense<0.000000e+00> : vector<4x16xf32>
    %67 = vector.multi_reduction <add>, %66, %cst_19 [2] : vector<4x16x16xf32> to vector<4x16xf32>
    %68 = vector.shape_cast %67 : vector<4x16xf32> to vector<4x16x1xf32>
    %69 = tpu.reciprocal %68 {approx = true} : vector<4x16x1xf32> -> vector<4x16x1xf32>
    %70 = vector.broadcast %69 : vector<4x16x1xf32> to vector<4x16x16xf32>
    %71 = arith.mulf %66, %70 : vector<4x16x16xf32>
    "tpu.trace_start"() <{level = 10 : i32, message = "hqk,hkd->hqd"}> : () -> ()
    %cst_20 = arith.constant dense<0.000000e+00> : vector<4x16x8xf32>
    %72 = tpu.matmul %71, %45, %cst_20 {dimension_numbers = #tpu.dot_dimension_numbers<[2], [1], [1], [2], [0, 0, 0, 1, 1, 2], [0], [0]>} : vector<4x16x16xf32>, vector<4x16x8xf32>, vector<4x16x8xf32> -> vector<4x16x8xf32>
    "tpu.trace_stop"() : () -> ()
    %73 = vector.extract_strided_slice %72 {offsets = [0, 0, 0], sizes = [1, 16, 8], strides = [1, 1, 1]} : vector<4x16x8xf32> to vector<1x16x8xf32>
    %74 = vector.shape_cast %73 : vector<1x16x8xf32> to vector<16x8xf32>
    %75 = vector.extract_strided_slice %72 {offsets = [1, 0, 0], sizes = [1, 16, 8], strides = [1, 1, 1]} : vector<4x16x8xf32> to vector<1x16x8xf32>
    %76 = vector.shape_cast %75 : vector<1x16x8xf32> to vector<16x8xf32>
    %77 = vector.extract_strided_slice %72 {offsets = [2, 0, 0], sizes = [1, 16, 8], strides = [1, 1, 1]} : vector<4x16x8xf32> to vector<1x16x8xf32>
    %78 = vector.shape_cast %77 : vector<1x16x8xf32> to vector<16x8xf32>
    %79 = vector.extract_strided_slice %72 {offsets = [3, 0, 0], sizes = [1, 16, 8], strides = [1, 1, 1]} : vector<4x16x8xf32> to vector<1x16x8xf32>
    %80 = vector.shape_cast %79 : vector<1x16x8xf32> to vector<16x8xf32>
    %81 = tpu.concatenate %74, %76, %78, %80 in 1 : vector<16x8xf32>, vector<16x8xf32>, vector<16x8xf32>, vector<16x8xf32> -> vector<16x32xf32>
    %cst_21 = arith.constant dense<0.000000e+00> : vector<16x32xf32>
    %82 = tpu.matmul %81, %2, %cst_21 {dimension_numbers = #tpu.dot_dimension_numbers<[1], [0], [0], [1], [0, 0, 1, 1], [], []>} : vector<16x32xf32>, vector<32x32xf32>, vector<16x32xf32> -> vector<16x32xf32>
    %83 = vector.broadcast %5 : vector<1x32xf32> to vector<16x32xf32>
    %84 = arith.addf %82, %83 : vector<16x32xf32>
    %85 = arith.addf %0, %84 : vector<16x32xf32>
    %cst_22 = arith.constant dense<0.000000e+00> : vector<16xf32>
    %86 = vector.multi_reduction <add>, %85, %cst_22 [1] : vector<16x32xf32> to vector<16xf32>
    %87 = vector.shape_cast %86 : vector<16xf32> to vector<16x1xf32>
    %cst_23 = arith.constant 3.200000e+01 : f32
    %88 = vector.broadcast %cst_23 : f32 to vector<16x1xf32>
    %89 = arith.divf %87, %88 : vector<16x1xf32>
    %90 = vector.broadcast %89 : vector<16x1xf32> to vector<16x32xf32>
    %91 = arith.subf %85, %90 : vector<16x32xf32>
    %92 = arith.mulf %91, %91 : vector<16x32xf32>
    %cst_24 = arith.constant dense<0.000000e+00> : vector<16xf32>
    %93 = vector.multi_reduction <add>, %92, %cst_24 [1] : vector<16x32xf32> to vector<16xf32>
    %94 = vector.shape_cast %93 : vector<16xf32> to vector<16x1xf32>
    %cst_25 = arith.constant 3.200000e+01 : f32
    %95 = vector.broadcast %cst_25 : f32 to vector<16x1xf32>
    %96 = arith.divf %94, %95 : vector<16x1xf32>
    %97 = vector.broadcast %89 : vector<16x1xf32> to vector<16x32xf32>
    %98 = arith.subf %85, %97 : vector<16x32xf32>
    %cst_26 = arith.constant 9.99999974E-6 : f32
    %99 = vector.broadcast %cst_26 : f32 to vector<16x1xf32>
    %100 = arith.addf %96, %99 : vector<16x1xf32>
    %101 = math.sqrt %100 : vector<16x1xf32>
    %102 = vector.broadcast %101 : vector<16x1xf32> to vector<16x32xf32>
    %103 = arith.divf %98, %102 : vector<16x32xf32>
    %104 = vector.broadcast %6 : vector<1x32xf32> to vector<16x32xf32>
    %105 = arith.mulf %104, %103 : vector<16x32xf32>
    %106 = vector.broadcast %7 : vector<1x32xf32> to vector<16x32xf32>
    %107 = arith.addf %105, %106 : vector<16x32xf32>
    %cst_27 = arith.constant dense<0.000000e+00> : vector<16x128xf32>
    %108 = tpu.matmul %107, %3, %cst_27 {dimension_numbers = #tpu.dot_dimension_numbers<[1], [0], [0], [1], [0, 0, 1, 1], [], []>} : vector<16x32xf32>, vector<32x128xf32>, vector<16x128xf32> -> vector<16x128xf32>
    %109 = vector.broadcast %8 : vector<1x128xf32> to vector<16x128xf32>
    %110 = arith.addf %108, %109 : vector<16x128xf32>
    %cst_28 = arith.constant 5.000000e-01 : f32
    %111 = vector.broadcast %cst_28 : f32 to vector<16x128xf32>
    %112 = arith.mulf %111, %110 : vector<16x128xf32>
    %cst_29 = arith.constant 4.471500e-02 : f32
    %113 = vector.broadcast %cst_29 : f32 to vector<16x128xf32>
    %114 = arith.mulf %113, %110 : vector<16x128xf32>
    %115 = arith.mulf %114, %110 : vector<16x128xf32>
    %116 = arith.mulf %115, %110 : vector<16x128xf32>
    %117 = arith.addf %110, %116 : vector<16x128xf32>
    %cst_30 = arith.constant 0.797884583 : f32
    %118 = vector.broadcast %cst_30 : f32 to vector<16x128xf32>
    %119 = arith.mulf %118, %117 : vector<16x128xf32>
    %120 = math.tanh %119 : vector<16x128xf32>
    %cst_31 = arith.constant 1.000000e+00 : f32
    %121 = vector.broadcast %cst_31 : f32 to vector<16x128xf32>
    %122 = arith.addf %121, %120 : vector<16x128xf32>
    %123 = arith.mulf %112, %122 : vector<16x128xf32>
    %c0_32 = arith.constant 0 : index
    %c0_33 = arith.constant 0 : index
    %124 = vector.load %arg2[%c0_32, %c0_33] : memref<128x32xf32, #tpu.memory_space<vmem>>, vector<128x32xf32>
    %cst_34 = arith.constant dense<0.000000e+00> : vector<16x32xf32>
    %125 = tpu.matmul %123, %124, %cst_34 {dimension_numbers = #tpu.dot_dimension_numbers<[1], [0], [0], [1], [0, 0, 1, 1], [], []>} : vector<16x128xf32>, vector<128x32xf32>, vector<16x32xf32> -> vector<16x32xf32>
    %126 = vector.broadcast %9 : vector<1x32xf32> to vector<16x32xf32>
    %127 = arith.addf %125, %126 : vector<16x32xf32>
    %128 = arith.addf %107, %127 : vector<16x32xf32>
    %cst_35 = arith.constant dense<0.000000e+00> : vector<16xf32>
    %129 = vector.multi_reduction <add>, %128, %cst_35 [1] : vector<16x32xf32> to vector<16xf32>
    %130 = vector.shape_cast %129 : vector<16xf32> to vector<16x1xf32>
    %cst_36 = arith.constant 3.200000e+01 : f32
    %131 = vector.broadcast %cst_36 : f32 to vector<16x1xf32>
    %132 = arith.divf %130, %131 : vector<16x1xf32>
    %133 = vector.broadcast %132 : vector<16x1xf32> to vector<16x32xf32>
    %134 = arith.subf %128, %133 : vector<16x32xf32>
    %135 = arith.mulf %134, %134 : vector<16x32xf32>
    %cst_37 = arith.constant dense<0.000000e+00> : vector<16xf32>
    %136 = vector.multi_reduction <add>, %135, %cst_37 [1] : vector<16x32xf32> to vector<16xf32>
    %137 = vector.shape_cast %136 : vector<16xf32> to vector<16x1xf32>
    %cst_38 = arith.constant 3.200000e+01 : f32
    %138 = vector.broadcast %cst_38 : f32 to vector<16x1xf32>
    %139 = arith.divf %137, %138 : vector<16x1xf32>
    %140 = vector.broadcast %132 : vector<16x1xf32> to vector<16x32xf32>
    %141 = arith.subf %128, %140 : vector<16x32xf32>
    %cst_39 = arith.constant 9.99999974E-6 : f32
    %142 = vector.broadcast %cst_39 : f32 to vector<16x1xf32>
    %143 = arith.addf %139, %142 : vector<16x1xf32>
    %144 = math.sqrt %143 : vector<16x1xf32>
    %145 = vector.broadcast %144 : vector<16x1xf32> to vector<16x32xf32>
    %146 = arith.divf %141, %145 : vector<16x32xf32>
    %147 = vector.broadcast %10 : vector<1x32xf32> to vector<16x32xf32>
    %148 = arith.mulf %147, %146 : vector<16x32xf32>
    %149 = vector.broadcast %11 : vector<1x32xf32> to vector<16x32xf32>
    %150 = arith.addf %148, %149 : vector<16x32xf32>
    %151 = tpu.concatenate %150, %15 in 1 : vector<16x32xf32>, vector<16x64xf32> -> vector<16x96xf32>
    %c0_40 = arith.constant 0 : index
    %c0_41 = arith.constant 0 : index
    %152 = vector.load %arg4[%c0_40, %c0_41] : memref<16x96xf32, #tpu.memory_space<vmem>>, vector<16x96xf32>
    tpu.vector_store %arg4[%c0_40, %c0_41], %151 {strides = array<i32>} : memref<16x96xf32, #tpu.memory_space<vmem>>, vector<16x96xf32>,
    return
  }
}

</mosaic_0001>

<bundles_post_ra>
// kernel: tpu_custom_call.1
= control target key start
LH: loop header
LB: loop body
LE: loop exit
PB: predicated region body
PF: predicated region fallthrough
CT: control target
= control target key end

     0   :  { %s1382_s0 = inlined_call_operand.vmem [shape: f32[16,32], index: 0, kind: input, shape index: {}]   ;;  %s1383_s1 = inlined_call_operand.vmem [shape: f32[32,256], index: 1, kind: input, shape index: {}]   ;;  %s1384_s2 = inlined_call_operand.vmem [shape: f32[128,32], index: 2, kind: input, shape index: {}]   ;;  %s1385_s3 = inlined_call_operand.vmem [shape: f32[8,128], index: 3, kind: input, shape index: {}]   ;;  %s1386_s4 = inlined_call_operand.hbm [shape: f32[16,96], index: 4, kind: output, shape index: {}]  }
   0x1   :  { %v1050_v0 = vld [vmem:[%s1383_s1 + $0x30] sm:$0xff]  ;;  %v1055_v1 = vld [vmem:[%s1383_s1 + $0x20] sm:$0xff] }
   0x2   :  { %56 = vmatpush.msra.mxu0 %v1050_v0  ;;  %v912_v2 = vpack.i.bf16 %v1055_v1, %v1050_v0  ;;  %v1063_v3 = vld [vmem:[%s1383_s1 + $0x10] sm:$0xff]  ;;  %v1068_v4 = vld [vmem:[%s1383_s1] sm:$0xff] }
   0x3   :  { %v917_v5 = vpack.i.bf16 %v1068_v4, %v1063_v3 }
   0x4   :  { %57 = vmatpush.msra.mxu0 %v1055_v1 }
   0x5   :  { %9 = vsyncpa [#allocation3], 0  ;;  %v1077_v6 = vld [vmem:[%s1382_s0] sm:$0xff]  ;;  %vm37_vm0 = vcmask 261120   ;;  %v1085_v7 = vld [vmem:[%s1382_s0 + $0x8] sm:$0xff]  ;;  %s1010_s29 = smov 104   ;;  %v230_v27 = vlaneseq }
   0x6   :  { %58 = vmatpush.msra.mxu0 %v1063_v3  ;;  %v922_v9 = vld [vmem:[%s1385_s3] ss:$0 sm:$0xff]  ;;  %s1011_s30 = smov 112   ;;  %s1012_s5 = smov 120   ;;  %vm85_vm1 = vcmask 64512   ;;  %vm256_vm5 = vcmask 130048  }
   0x7   :  { %s1013_s0 = smov 96   ;;  %v231_v28 = vshrl.u32 %v230_v27, 7  ;;  %v234_v29 = vand.u32 127, %v230_v27  ;;  %s1014_s6 = smov 64   ;;  %vm513_vm9 = vcmask 195584  }
   0x8   :  { %59 = vmatpush.msra.mxu0 %v1068_v4  ;;  %s1015_s7 = smov 32   ;;  %s1016_s8 = smov 8  }
   0x9   :  { %848 = vmatmul.msk.f32.vlgmr.msra.gmra.mxu0 %vm37_vm0, %v1077_v6  ;;  %v235_v30 = vshra.s32 %v231_v28, 3  ;;  %v237_v31 = vshra.s32 %v234_v29, 3  ;;  %v232_v32 = vadd.s32 8, %v231_v28  ;;  %vm240_vm3 = vcmp.le.s32.totalorder %v234_v29, %v231_v28  ;;  %s1017_s9 = smov 16   ;;  %s1018_s10 = smov 24  }
   0xa   :  { %s836_s13 = sshll.u32 %s1386_s4, 4  ;;  %s1021_s14 = smov 128   ;;  %s837_s13 = int_to_ptr.hbm [resolvable:$true] %s836_s13 }
   0xb   :  { %vm238_vm2 = vcmp.eq.s32.totalorder %v235_v30, %v237_v31  ;;  %v236_v33 = vshra.s32 %v232_v32, 3  ;;  %vm241_vm7 = vcmp.le.s32.totalorder %v234_v29, %v232_v32 }
   0xc   :  { %vm1148_vm4 = vmand %vm238_vm2, %vm240_vm3 }
   0xd   :  { %vm239_vm6 = vcmp.eq.s32.totalorder %v236_v33, %v237_v31 }
   0xe   :  { %vm1155_vm8 = vmand %vm239_vm6, %vm241_vm7 }
  0x11   :  { %849 = vmatmul.msk.f32.gmra.mxu0 %vm37_vm0, %v1085_v7 }
  0x86   :  { %v61_v8 = vpop.f32.mrf.mxu0 }
  0x87   :  { %v1097_v12 = vadd.f32 %v922_v9, %v61_v8 }
  0x8e   :  { %v64_v10 = vpop.f32.mrf.mxu0 }
  0x8f   :  { %v1092_v11 = vadd.f32 %v922_v9, %v64_v10 }
  0x91   :  { %79 = vrot.lane.b32.xlu2 %v1092_v11, %s1010_s29  ;;  %75 = vrot.lane.b32.xlu1 %v1092_v11, %s1011_s30 }
  0x92   :  { %71 = vrot.lane.b32.xlu0 %v1092_v11, %s1012_s5 }
  0x99   :  { %77 = vrot.lane.b32.xlu2 %v1097_v12, %s1010_s29  ;;  %73 = vrot.lane.b32.xlu1 %v1097_v12, %s1011_s30 }
  0x9a   :  { %69 = vrot.lane.b32.xlu0 %v1097_v12, %s1012_s5 }
  0xeb   :  { %v1102_v13 = vpop.permute.xlu2 %79 }
  0xf3   :  { %v1110_v16 = vpop.permute.xlu2 %77 }
 0x103   :  { %v1104_v14 = vpop.permute.xlu1 %75 }
 0x104   :  { %v1106_v15 = vpop.permute.xlu0 %71  ;;  %154 = vrot.lane.b32.xlu2 %v1104_v14, %s1013_s0 }
 0x105   :  { %119 = vrot.lane.b32.xlu0 %v1106_v15, %s1013_s0 }
 0x10b   :  { %v1112_v17 = vpop.permute.xlu1 %73 }
 0x10c   :  { %v1114_v18 = vpop.permute.xlu0 %69  ;;  %187 = vrot.lane.b32.xlu2 %v1110_v16, %s1013_s0 }
 0x10d   :  { %152 = vrot.lane.b32.xlu0 %v1112_v17, %s1013_s0  ;;  %117 = vrot.lane.b32.xlu1 %v1114_v18, %s1013_s0 }
 0x115   :  { %83 = vrot.lane.b32.xlu0 %v1092_v11, %s1013_s0  ;;  %189 = vrot.lane.b32.xlu1 %v1102_v13, %s1013_s0 }
 0x11d   :  { %81 = vrot.lane.b32.xlu1 %v1097_v12, %s1013_s0 }
 0x15e   :  { %v155_v19 = vpop.permute.xlu2 %154 }
 0x15f   :  { %858 = vmatpush.xpose.msk.msrb.mxu0 %vm85_vm1, %v155_v19  ;;  %878 = vmatpush.xpose.msk.msra.mxu3 %vm85_vm1, %v155_v19 }
 0x166   :  { %v188_v25 = vpop.permute.xlu2 %187 }
 0x177   :  { %v120_v20 = vpop.permute.xlu0 %119 }
 0x178   :  { %854 = vmatpush.xpose.msk.msra.mxu2 %vm85_vm1, %v120_v20 }
 0x17f   :  { %v118_v21 = vpop.permute.xlu1 %117  ;;  %v153_v22 = vpop.permute.xlu0 %152 }
 0x180   :  { %855 = vmatpush.xpose.msk.msra.mxu2 %vm85_vm1, %v118_v21  ;;  %859 = vmatpush.xpose.msk.msrb.mxu0 %vm85_vm1, %v153_v22 }
 0x181   :  { %879 = vmatpush.xpose.msk.msra.mxu3 %vm85_vm1, %v153_v22 }
 0x183   :  { %856 = vmatmul.msk.f32.vlgmr.msra.gmra.mxu2 %vm85_vm1, %v1114_v18  ;;  %860 = vmatmul.msk.f32.vlgmr.msrb.gmra.mxu0 %vm85_vm1, %v1112_v17 }
 0x184   :  { %861 = vmatmul.msk.f32.vlgmr.msra.gmra.mxu3 %vm85_vm1, %v1104_v14 }
 0x187   :  { %v190_v23 = vpop.permute.xlu1 %189  ;;  %v84_v24 = vpop.permute.xlu0 %83 }
 0x188   :  { %850 = vmatpush.xpose.msk.msra.mxu1 %vm85_vm1, %v84_v24  ;;  %862 = vmatpush.xpose.msk.msra.mxu0 %vm85_vm1, %v190_v23 }
 0x18b   :  { %857 = vmatmul.msk.f32.gmra.mxu2 %vm85_vm1, %v1106_v15 }
 0x18c   :  { %863 = vmatpush.xpose.msk.msra.mxu0 %vm85_vm1, %v188_v25 }
 0x18f   :  { %v82_v26 = vpop.permute.xlu1 %81  ;;  %864 = vmatmul.msk.f32.vlgmr.msra.gmra.mxu0 %vm85_vm1, %v1110_v16 }
 0x190   :  { %851 = vmatpush.xpose.msk.msra.mxu1 %vm85_vm1, %v82_v26 }
 0x193   :  { %852 = vmatmul.msk.f32.vlgmr.msra.gmra.mxu1 %vm85_vm1, %v1097_v12 }
 0x197   :  { %865 = vmatmul.msk.f32.gmra.mxu0 %vm85_vm1, %v1102_v13 }
 0x19b   :  { %853 = vmatmul.msk.f32.gmra.mxu1 %vm85_vm1, %v1092_v11 }
 0x200   :  { %v181_v36 = vpop.f32.mrf.mxu0 }
 0x201   :  { %v226_v61 = vmul.f32 0.35355338, %v181_v36 }
 0x203   :  { %v252_v62 = vsel %vm1148_vm4, %v226_v61, -1e+09 }
 0x204   :  { %v269_v8 = vsel %vm256_vm5, %v252_v62, -inf }
 0x206   :  { %v146_v34 = vpop.f32.mrf.mxu2 }
 0x207   :  { %v224_v35 = vmul.f32 0.35355338, %v146_v34  ;;  %v184_v37 = vpop.f32.mrf.mxu3 }
 0x208   :  { %v227_v41 = vmul.f32 0.35355338, %v184_v37  ;;  %v892_v37 = vpack.i.bf16 %v1104_v14, %v1106_v15 }
 0x209   :  { %v250_v39 = vsel %vm1148_vm4, %v224_v35, -1e+09 }
 0x20a   :  { %v263_v40 = vsel %vm256_vm5, %v250_v39, -inf  ;;  %v253_v43 = vsel %vm1155_vm8, %v227_v41, -1e+09 }
 0x20b   :  { %264 = vmax.xlane.f32.xlu2 %v263_v40  ;;  %v272_v48 = vsel %vm256_vm5, %v253_v43, -inf  ;;  %v902_v40 = vpack.i.bf16 %v1110_v16, %v1102_v13 }
 0x20c   :  { %v216_v44 = vpop.f32.mrf.mxu0 }
 0x20d   :  { %v228_v49 = vmul.f32 0.35355338, %v216_v44 }
 0x20e   :  { %v149_v47 = vpop.f32.mrf.mxu2 }
 0x20f   :  { %v225_v52 = vmul.f32 0.35355338, %v149_v47  ;;  %v254_v53 = vsel %vm1148_vm4, %v228_v49, -1e+09 }
 0x210   :  { %v111_v45 = vpop.f32.mrf.mxu1  ;;  %v275_v57 = vsel %vm256_vm5, %v254_v53, -inf }
 0x211   :  { %v222_v46 = vmul.f32 0.35355338, %v111_v45  ;;  %v251_v56 = vsel %vm1155_vm8, %v225_v52, -1e+09 }
 0x212   :  { %v266_v59 = vsel %vm256_vm5, %v251_v56, -inf }
 0x213   :  { %273 = vmax.xlane.f32.xlu2 %v272_v48  ;;  %v1164_v50 = vsel %vm1148_vm4, %v222_v46, -1e+09  ;;  %v897_v48 = vpack.i.bf16 %v1112_v17, %v1114_v18  ;;  %v907_v17 = vpack.i.bf16 %v1097_v12, %v1092_v11 }
 0x214   :  { %v257_v51 = vsel %vm256_vm5, %v1164_v50, -inf  ;;  %v219_v63 = vpop.f32.mrf.mxu0 }
 0x215   :  { %258 = vmax.xlane.f32.xlu1 %v257_v51  ;;  %v229_v9 = vmul.f32 0.35355338, %v219_v63 }
 0x217   :  { %v255_v10 = vsel %vm1155_vm8, %v229_v9, -1e+09 }
 0x218   :  { %v114_v54 = vpop.f32.mrf.mxu1  ;;  %v278_v19 = vsel %vm256_vm5, %v255_v10, -inf }
 0x219   :  { %v223_v55 = vmul.f32 0.35355338, %v114_v54 }
 0x21b   :  { %276 = vmax.xlane.f32.xlu2 %v275_v57  ;;  %v1175_v58 = vsel %vm1155_vm8, %v223_v55, -1e+09 }
 0x21c   :  { %v260_v60 = vsel %vm256_vm5, %v1175_v58, -inf }
 0x21d   :  { %267 = vmax.xlane.f32.xlu1 %v266_v59  ;;  %261 = vmax.xlane.f32.xlu0 %v260_v60 }
 0x225   :  { %270 = vmax.xlane.f32.xlu0 %v269_v8 }
 0x22d   :  { %279 = vmax.xlane.f32.xlu0 %v278_v19 }
 0x27e   :  { %v265_v20 = vpop.xlane.xlu2 %264 }
 0x27f   :  { %v283_v21 = vsub.f32 %v250_v39, %v265_v20 }
 0x281   :  { %v293_v22 = vmul.f32 1.442695, %v283_v21 }
 0x283   :  { %930 = vpow2.f32 %v293_v22 }
 0x286   :  { %v274_v23 = vpop.xlane.xlu2 %273 }
 0x287   :  { %v286_v24 = vsub.f32 %v253_v43, %v274_v23 }
 0x288   :  { %v259_v43 = vpop.xlane.xlu1 %258 }
 0x289   :  { %v1186_v25 = vpop.eup %930  ;;  %v299_v26 = vmul.f32 1.442695, %v286_v24  ;;  %v281_v52 = vsub.f32 %v1164_v50, %v259_v43 }
 0x28a   :  { %v311_v27 = vsel %vm256_vm5, %v1186_v25, 0.0 }
 0x28b   :  { %932 = vpow2.f32 %v299_v26  ;;  %312 = vadd.xlane.f32.xlu2 %v311_v27 }
 0x28e   :  { %v277_v31 = vpop.xlane.xlu2 %276 }
 0x28f   :  { %v287_v34 = vsub.f32 %v254_v53, %v277_v31  ;;  %v289_v53 = vmul.f32 1.442695, %v281_v52 }
 0x290   :  { %v262_v28 = vpop.xlane.xlu0 %261  ;;  %v268_v15 = vpop.xlane.xlu1 %267 }
 0x291   :  { %v1190_v29 = vpop.eup %932  ;;  %v301_v36 = vmul.f32 1.442695, %v287_v34  ;;  %v284_v46 = vsub.f32 %v251_v56, %v268_v15  ;;  %v282_v55 = vsub.f32 %v1175_v58, %v262_v28 }
 0x292   :  { %v320_v30 = vsel %vm256_vm5, %v1190_v29, 0.0 }
 0x293   :  { %321 = vadd.xlane.f32.xlu0 %v320_v30  ;;  %v295_v47 = vmul.f32 1.442695, %v284_v46  ;;  %v291_v57 = vmul.f32 1.442695, %v282_v55 }
 0x298   :  { %v271_v32 = vpop.xlane.xlu0 %270 }
 0x299   :  { %v285_v33 = vsub.f32 %v252_v62, %v271_v32 }
 0x29b   :  { %v297_v35 = vmul.f32 1.442695, %v285_v33 }
 0x29d   :  { %934 = vpow2.f32 %v297_v35 }
 0x29e   :  { %936 = vpow2.f32 %v301_v36 }
 0x2a0   :  { %v280_v44 = vpop.xlane.xlu0 %279 }
 0x2a1   :  { %v288_v14 = vsub.f32 %v255_v10, %v280_v44 }
 0x2a3   :  { %v1196_v38 = vpop.eup %934  ;;  %893 = vrot.lane.b32.xlu2 %v892_v37, %s1014_s6  ;;  %v303_v45 = vmul.f32 1.442695, %v288_v14 }
 0x2a4   :  { %v317_v39 = vsel %vm256_vm5, %v1196_v38, 0.0  ;;  %v937_v41 = vpop.eup %936 }
 0x2a5   :  { %318 = vadd.xlane.f32.xlu1 %v317_v39  ;;  %v323_v42 = vsel %vm256_vm5, %v937_v41, 0.0  ;;  %938 = vpow2.f32 %v303_v45 }
 0x2a6   :  { %940 = vpow2.f32 %v295_v47 }
 0x2a7   :  { %903 = vrot.lane.b32.xlu0 %v902_v40, %s1014_s6  ;;  %942 = vpow2.f32 %v289_v53 }
 0x2a8   :  { %944 = vpow2.f32 %v291_v57 }
 0x2ab   :  { %v1205_v13 = vpop.eup %938 }
 0x2ac   :  { %v326_v16 = vsel %vm256_vm5, %v1205_v13, 0.0  ;;  %v1209_v49 = vpop.eup %940 }
 0x2ad   :  { %324 = vadd.xlane.f32.xlu1 %v323_v42  ;;  %v314_v51 = vsel %vm256_vm5, %v1209_v49, 0.0  ;;  %v1216_v18 = vpop.eup %942 }
 0x2ae   :  { %v305_v54 = vsel %vm256_vm5, %v1216_v18, 0.0  ;;  %v945_v61 = vpop.eup %944 }
 0x2af   :  { %v308_v62 = vsel %vm256_vm5, %v945_v61, 0.0 }
 0x2c6   :  { %898 = vrot.lane.b32.xlu1 %v897_v48, %s1014_s6 }
 0x2cc   :  { %327 = vadd.xlane.f32.xlu2 %v326_v16 }
 0x2d1   :  { %315 = vadd.xlane.f32.xlu0 %v314_v51 }
 0x2e4   :  { %913 = vrot.lane.b32.xlu2 %v912_v2, %s1015_s7 }
 0x2e5   :  { %908 = vrot.lane.b32.xlu0 %v907_v17, %s1014_s6 }
 0x2f0   :  { %306 = vadd.xlane.f32.xlu1 %v305_v54 }
 0x2fe   :  { %v313_v56 = vpop.xlane.xlu2 %312 }
 0x306   :  { %v894_v59 = vpop.permute.xlu2 %893  ;;  %v322_v63 = vpop.xlane.xlu0 %321 }
 0x307   :  { %v895_v60 = vunpack.i.l.bf16 %v894_v59  ;;  %v896_v50 = vunpack.i.h.bf16 %v894_v59 }
 0x309   :  { %406 = vmatpush.msrb.mxu2 %v895_v60  ;;  %441 = vmatpush.msrb.mxu3 %v896_v50 }
 0x30f   :  { %309 = vadd.xlane.f32.xlu0 %v308_v62 }
 0x318   :  { %v319_v8 = vpop.xlane.xlu1 %318 }
 0x319   :  { %v904_v9 = vpop.permute.xlu0 %903 }
 0x31a   :  { %v905_v10 = vunpack.i.l.bf16 %v904_v9  ;;  %v906_v19 = vunpack.i.h.bf16 %v904_v9 }
 0x31c   :  { %476 = vmatpush.msrb.mxu0 %v905_v10 }
 0x31e   :  { %477 = vmatpush.msrb.mxu0 %v906_v19 }
 0x320   :  { %v325_v58 = vpop.xlane.xlu1 %324 }
 0x321   :  { %946 = vrcp.f32 %v325_v58 }
 0x322   :  { %948 = vrcp.f32 %v313_v56 }
 0x323   :  { %918 = vrot.lane.b32.xlu0 %v917_v5, %s1015_s7  ;;  %950 = vrcp.f32 %v319_v8 }
 0x324   :  { %952 = vrcp.f32 %v322_v63 }
 0x327   :  { %v947_v20 = vpop.eup %946 }
 0x328   :  { %v343_v21 = vmul.f32 %v947_v20, %v937_v41  ;;  %v949_v22 = vpop.eup %948 }
 0x329   :  { %v951_v23 = vpop.eup %950  ;;  %v339_v28 = vmul.f32 %v949_v22, %v1186_v25 }
 0x32a   :  { %872 = vmatmul.msk.f32.vlgmr.msrb.gmra.mxu0 %vm256_vm5, %v343_v21  ;;  %v341_v30 = vmul.f32 %v951_v23, %v1196_v38  ;;  %v953_v0 = vpop.eup %952  ;;  %v1019_v21 = vmov 32.0  }
 0x32b   :  { %v342_v2 = vmul.f32 %v953_v0, %v1190_v29 }
 0x338   :  { %v899_v24 = vpop.permute.xlu1 %898 }
 0x339   :  { %v900_v26 = vunpack.i.l.bf16 %v899_v24  ;;  %v901_v27 = vunpack.i.h.bf16 %v899_v24 }
 0x33b   :  { %407 = vmatpush.msrb.mxu2 %v900_v26  ;;  %442 = vmatpush.msrb.mxu3 %v901_v27 }
 0x33c   :  { %868 = vmatmul.msk.f32.vlgmr.msrb.gmra.mxu2 %vm256_vm5, %v339_v28  ;;  %870 = vmatmul.msk.f32.vlgmr.msrb.gmra.mxu3 %vm256_vm5, %v341_v30 }
 0x33f   :  { %v328_v1 = vpop.xlane.xlu2 %327 }
 0x340   :  { %954 = vrcp.f32 %v328_v1 }
 0x344   :  { %871 = vmatmul.msk.f32.gmra.mxu3 %vm256_vm5, %v342_v2  ;;  %v316_v3 = vpop.xlane.xlu0 %315 }
 0x345   :  { %956 = vrcp.f32 %v316_v3 }
 0x346   :  { %v955_v4 = vpop.eup %954 }
 0x347   :  { %v344_v5 = vmul.f32 %v955_v4, %v1205_v13  ;;  %v914_v15 = vpop.permute.xlu2 %913 }
 0x348   :  { %v916_v45 = vunpack.i.h.bf16 %v914_v15  ;;  %v915_v46 = vunpack.i.l.bf16 %v914_v15 }
 0x349   :  { %873 = vmatmul.msk.f32.gmra.mxu0 %vm256_vm5, %v344_v5 }
 0x34b   :  { %v957_v25 = vpop.eup %956 }
 0x34c   :  { %v340_v31 = vmul.f32 %v957_v25, %v1209_v49 }
 0x34e   :  { %869 = vmatmul.msk.f32.gmra.mxu2 %vm256_vm5, %v340_v31 }
 0x357   :  { %v909_v32 = vpop.permute.xlu0 %908 }
 0x358   :  { %v910_v33 = vunpack.i.l.bf16 %v909_v32  ;;  %v911_v34 = vunpack.i.h.bf16 %v909_v32 }
 0x35a   :  { %371 = vmatpush.msrb.mxu1 %v910_v33 }
 0x35c   :  { %372 = vmatpush.msrb.mxu1 %v911_v34  ;;  %v27_v34 = vld [vmem:[%s1383_s1 + $0x38] sm:$0xff] }
 0x35d   :  { %672 = vmatpush.msra.mxu2 %v27_v34  ;;  %v711_v34 = vld [vmem:[%s1384_s2 + $0x50] sm:$0xff] }
 0x35e   :  { %551 = vmatpush.msra.mxu1 %v915_v46 }
 0x360   :  { %552 = vmatpush.msra.mxu1 %v916_v45 }
 0x363   :  { %v307_v29 = vpop.xlane.xlu1 %306 }
 0x364   :  { %958 = vrcp.f32 %v307_v29  ;;  %v26_v29 = vld [vmem:[%s1383_s1 + $0x28] sm:$0xff] }
 0x365   :  { %673 = vmatpush.msra.mxu2 %v26_v29  ;;  %v710_v29 = vld [vmem:[%s1384_s2 + $0x48] sm:$0xff] }
 0x36a   :  { %v959_v35 = vpop.eup %958 }
 0x36b   :  { %v337_v36 = vmul.f32 %v959_v35, %v1216_v18  ;;  %v25_v35 = vld [vmem:[%s1383_s1 + $0x18] sm:$0xff] }
 0x36c   :  { %674 = vmatpush.msra.mxu2 %v25_v35  ;;  %v708_v35 = vld [vmem:[%s1384_s2 + $0x38] sm:$0xff] }
 0x36d   :  { %866 = vmatmul.msk.f32.vlgmr.msrb.gmra.mxu1 %vm256_vm5, %v337_v36  ;;  %v24_v36 = vld [vmem:[%s1383_s1 + $0x8] sm:$0xff] }
 0x36e   :  { %675 = vmatpush.msra.mxu2 %v24_v36  ;;  %v707_v36 = vld [vmem:[%s1384_s2 + $0x30] sm:$0xff] }
 0x382   :  { %v310_v37 = vpop.xlane.xlu0 %309 }
 0x383   :  { %960 = vrcp.f32 %v310_v37 }
 0x384   :  { %962 = vrcp.f32 %v1019_v21  ;;  %v925_v21 = vld [vmem:[%s1385_s3 + $0x3] ss:$0 sm:$0xff] }
 0x389   :  { %v961_v38 = vpop.eup %960 }
 0x38a   :  { %v338_v39 = vmul.f32 %v961_v38, %v945_v61  ;;  %v923_v61 = vld [vmem:[%s1385_s3 + $0x1] ss:$0 sm:$0xff]  ;;  %v963_v22 = vpop.eup %962 }
 0x38b   :  { %v571_v23 = vmul.f32 32.0, %v963_v22  ;;  %vm575_vm10 = vweird.f32 %v963_v22 }
 0x38c   :  { %867 = vmatmul.msk.f32.gmra.mxu1 %vm256_vm5, %v338_v39 }
 0x38d   :  { %v572_v24 = vsub.f32 1.0, %v571_v23 }
 0x38f   :  { %v573_v26 = vmul.f32 %v963_v22, %v572_v24 }
 0x391   :  { %v574_v27 = vadd.f32 %v963_v22, %v573_v26 }
 0x393   :  { %v1257_v28 = vsel %vm575_vm10, %v963_v22, %v574_v27 }
 0x395   :  { %v919_v47 = vpop.permute.xlu0 %918 }
 0x396   :  { %v921_v48 = vunpack.i.h.bf16 %v919_v47  ;;  %v920_v13 = vunpack.i.l.bf16 %v919_v47 }
 0x398   :  { %553 = vmatpush.msra.mxu1 %v920_v13 }
 0x39a   :  { %554 = vmatpush.msra.mxu1 %v921_v48 }
 0x3a7   :  { %v479_v40 = vpop.f32.mrf.mxu0 }
 0x3bf   :  { %v409_v41 = vpop.f32.mrf.mxu2  ;;  %v444_v42 = vpop.f32.mrf.mxu3 }
 0x3c0   :  { %487 = vrot.lane.b32.xlu1 %v409_v41, %s1016_s8  ;;  %495 = vrot.lane.b32.xlu2 %v444_v42, %s1017_s9 }
 0x3c6   :  { %v482_v43 = vpop.f32.mrf.mxu0 }
 0x3c7   :  { %505 = vrot.lane.b32.xlu0 %v482_v43, %s1018_s10  ;;  %v447_v44 = vpop.f32.mrf.mxu3 }
 0x3c8   :  { %503 = vrot.lane.b32.xlu2 %v479_v40, %s1018_s10 }
 0x3d0   :  { %497 = vrot.lane.b32.xlu2 %v447_v44, %s1017_s9 }
 0x3d1   :  { %v412_v14 = vpop.f32.mrf.mxu2 }
 0x3d2   :  { %489 = vrot.lane.b32.xlu1 %v412_v14, %s1016_s8 }
 0x3ea   :  { %v374_v49 = vpop.f32.mrf.mxu1 }
 0x409   :  { %v377_v54 = vpop.f32.mrf.mxu1 }
 0x41a   :  { %v496_v16 = vpop.permute.xlu2 %495 }
 0x422   :  { %v504_v53 = vpop.permute.xlu2 %503 }
 0x42a   :  { %v498_v56 = vpop.permute.xlu2 %497 }
 0x432   :  { %v488_v51 = vpop.permute.xlu1 %487 }
 0x433   :  { %v509_v52 = vsel %vm85_vm1, %v374_v49, %v488_v51 }
 0x434   :  { %v511_v17 = vsel %vm256_vm5, %v509_v52, %v496_v16 }
 0x435   :  { %v514_v18 = vsel %vm513_vm9, %v511_v17, %v504_v53  ;;  %v716_v17 = vld [vmem:[%s1384_s2 + $0x78] sm:$0xff] }
 0x436   :  { %874 = vmatmul.msk.f32.vlgmr.msra.gmra.mxu1 %vm37_vm0, %v514_v18  ;;  %v715_v18 = vld [vmem:[%s1384_s2 + $0x70] sm:$0xff]  ;;  %718 = vmatpush.msra.mxu3 %v716_v17 }
 0x438   :  { %719 = vmatpush.msra.mxu3 %v715_v18 }
 0x439   :  { %v506_v59 = vpop.permute.xlu0 %505 }
 0x444   :  { %v490_v55 = vpop.permute.xlu1 %489 }
 0x445   :  { %v510_v57 = vsel %vm85_vm1, %v377_v54, %v490_v55 }
 0x446   :  { %v512_v60 = vsel %vm256_vm5, %v510_v57, %v498_v56 }
 0x447   :  { %v515_v50 = vsel %vm513_vm9, %v512_v60, %v506_v59  ;;  %v714_v59 = vld [vmem:[%s1384_s2 + $0x68] sm:$0xff] }
 0x448   :  { %875 = vmatmul.msk.f32.gmra.mxu1 %vm37_vm0, %v515_v50  ;;  %720 = vmatpush.msra.mxu3 %v714_v59 }
 0x4b3   :  { %v556_v62 = vpop.f32.mrf.mxu1 }
 0x4b4   :  { %v557_v63 = vadd.f32 %v923_v61, %v556_v62 }
 0x4b6   :  { %v562_v8 = vadd.f32 %v557_v63, %v1077_v6 }
 0x4b8   :  { %v564_v9 = vsel %vm37_vm0, %v562_v8, 0.0 }
 0x4b9   :  { %565 = vadd.xlane.f32.xlu1 %v564_v9  ;;  %v924_v9 = vld [vmem:[%s1385_s3 + $0x2] ss:$0 sm:$0xff] }
 0x4c5   :  { %v559_v10 = vpop.f32.mrf.mxu1 }
 0x4c6   :  { %v560_v19 = vadd.f32 %v923_v61, %v559_v10  ;;  %v713_v61 = vld [vmem:[%s1384_s2 + $0x60] sm:$0xff] }
 0x4c7   :  { %721 = vmatpush.msra.mxu3 %v713_v61  ;;  %v927_v61 = vld [vmem:[%s1385_s3 + $0x5] ss:$0 sm:$0xff] }
 0x4c8   :  { %v563_v58 = vadd.f32 %v560_v19, %v1085_v7 }
 0x4ca   :  { %v567_v20 = vsel %vm37_vm0, %v563_v58, 0.0 }
 0x4cb   :  { %568 = vadd.xlane.f32.xlu2 %v567_v20 }
 0x52c   :  { %v566_v6 = vpop.xlane.xlu1 %565 }
 0x52d   :  { %v577_v30 = vmul.f32 %v1257_v28, %v566_v6 }
 0x52f   :  { %v1260_v0 = vsub.f32 %v562_v8, %v577_v30 }
 0x531   :  { %v581_v7 = vmul.f32 %v1260_v0, %v1260_v0 }
 0x533   :  { %v583_v1 = vsel %vm37_vm0, %v581_v7, 0.0 }
 0x534   :  { %584 = vadd.xlane.f32.xlu0 %v583_v1 }
 0x53e   :  { %v569_v2 = vpop.xlane.xlu2 %568 }
 0x53f   :  { %v578_v3 = vmul.f32 %v1257_v28, %v569_v2 }
 0x541   :  { %v1266_v4 = vsub.f32 %v563_v58, %v578_v3 }
 0x543   :  { %v582_v5 = vmul.f32 %v1266_v4, %v1266_v4 }
 0x545   :  { %v586_v25 = vsel %vm37_vm0, %v582_v5, 0.0 }
 0x546   :  { %587 = vadd.xlane.f32.xlu1 %v586_v25 }
 0x5a7   :  { %v585_v31 = vpop.xlane.xlu0 %584 }
 0x5a8   :  { %v589_v32 = vmul.f32 %v585_v31, %v1257_v28 }
 0x5aa   :  { %v591_v33 = vadd.f32 1e-05, %v589_v32 }
 0x5ac   :  { %964 = vrsqrt.f32 %v591_v33  ;;  %vm600_vm11 = vcmp.eq.f32.partialorder %v591_v33, inf  ;;  %v603_v45 = vand.u32 2147483648, %v591_v33  ;;  %vm602_vm12 = vcmp.eq.f32.partialorder %v591_v33, 0.0 }
 0x5b2   :  { %v965_v37 = vpop.eup %964 }
 0x5b3   :  { %v594_v38 = vmul.f32 %v965_v37, %v591_v33 }
 0x5b5   :  { %v595_v39 = vmul.f32 %v965_v37, %v594_v38  ;;  %v705_v38 = vld [vmem:[%s1384_s2 + $0x20] sm:$0xff] }
 0x5b7   :  { %v596_v40 = vmul.f32 0.5, %v595_v39  ;;  %v704_v39 = vld [vmem:[%s1384_s2 + $0x18] sm:$0xff] }
 0x5b9   :  { %v597_v41 = vsub.f32 1.5, %v596_v40  ;;  %v588_v42 = vpop.xlane.xlu1 %587  ;;  %v703_v40 = vld [vmem:[%s1384_s2 + $0x10] sm:$0xff] }
 0x5ba   :  { %v590_v43 = vmul.f32 %v588_v42, %v1257_v28  ;;  %v701_v42 = vld [vmem:[%s1384_s2] sm:$0xff] }
 0x5bb   :  { %v598_v44 = vmul.f32 %v965_v37, %v597_v41  ;;  %v706_v37 = vld [vmem:[%s1384_s2 + $0x28] sm:$0xff] }
 0x5bc   :  { %v592_v14 = vadd.f32 1e-05, %v590_v43  ;;  %v702_v41 = vld [vmem:[%s1384_s2 + $0x8] sm:$0xff]  ;;  %v926_v43 = vld [vmem:[%s1385_s3 + $0x4] ss:$0 sm:$0xff] }
 0x5bd   :  { %v599_v15 = vmul.f32 %v598_v44, %v591_v33 }
 0x5be   :  { %966 = vrsqrt.f32 %v592_v14  ;;  %vm612_vm2 = vcmp.eq.f32.partialorder %v592_v14, inf  ;;  %v615_v10 = vand.u32 2147483648, %v592_v14  ;;  %vm614_vm3 = vcmp.eq.f32.partialorder %v592_v14, 0.0 }
 0x5bf   :  { %v601_v46 = vsel %vm600_vm11, %v591_v33, %v599_v15  ;;  %v712_v33 = vld [vmem:[%s1384_s2 + $0x58] sm:$0xff] }
 0x5c0   :  { %v604_v47 = vsel %vm602_vm12, %v603_v45, %v601_v46  ;;  %722 = vmatpush.msra.mxu3 %v712_v33 }
 0x5c1   :  { %968 = vrcp.f32 %v604_v47  ;;  %v628_v55 = vand.u32 2147483648, %v604_v47  ;;  %v626_v57 = vand.u32 2147483647, %v604_v47  ;;  %vm622_vm14 = vweird.f32 %v604_v47 }
 0x5c2   :  { %723 = vmatpush.msra.mxu3 %v711_v34 }
 0x5c3   :  { %v629_v62 = vor.u32 1.1754944e-38, %v628_v55  ;;  %vm627_vm1 = vcmp.eq.f32.partialorder %v626_v57, 8.507059e+37 }
 0x5c4   :  { %v967_v48 = vpop.eup %966  ;;  %724 = vmatpush.msra.mxu3 %v710_v29 }
 0x5c5   :  { %v606_v13 = vmul.f32 %v967_v48, %v592_v14 }
 0x5c7   :  { %v969_v16 = vpop.eup %968  ;;  %v607_v49 = vmul.f32 %v967_v48, %v606_v13 }
 0x5c8   :  { %v618_v51 = vmul.f32 %v969_v16, %v604_v47  ;;  %vm623_vm13 = vweird.f32 %v969_v16 }
 0x5c9   :  { %v608_v52 = vmul.f32 0.5, %v607_v49  ;;  %vm624_vm15 = vmor %vm622_vm14, %vm623_vm13 }
 0x5ca   :  { %v619_v53 = vsub.f32 1.0, %v618_v51 }
 0x5cb   :  { %v609_v54 = vsub.f32 1.5, %v608_v52 }
 0x5cc   :  { %v620_v56 = vmul.f32 %v969_v16, %v619_v53 }
 0x5cd   :  { %v610_v60 = vmul.f32 %v967_v48, %v609_v54 }
 0x5ce   :  { %v621_v50 = vadd.f32 %v969_v16, %v620_v56 }
 0x5cf   :  { %v611_v63 = vmul.f32 %v610_v60, %v592_v14 }
 0x5d0   :  { %v625_v8 = vsel %vm624_vm15, %v969_v16, %v621_v50 }
 0x5d1   :  { %v630_v19 = vsel %vm627_vm1, %v629_v62, %v625_v8  ;;  %v613_v58 = vsel %vm612_vm2, %v592_v14, %v611_v63  ;;  %vm827_vm1 = vcmask 785408  }
 0x5d2   :  { %v631_v20 = vmul.f32 %v630_v19, %v1260_v0  ;;  %v616_v22 = vsel %vm614_vm3, %v615_v10, %v613_v58 }
 0x5d3   :  { %970 = vrcp.f32 %v616_v22  ;;  %v643_v30 = vand.u32 2147483648, %v616_v22  ;;  %v641_v1 = vand.u32 2147483647, %v616_v22  ;;  %vm637_vm5 = vweird.f32 %v616_v22 }
 0x5d4   :  { %v648_v23 = vmul.f32 %v924_v9, %v631_v20 }
 0x5d5   :  { %v644_v2 = vor.u32 1.1754944e-38, %v643_v30  ;;  %vm642_vm7 = vcmp.eq.f32.partialorder %v641_v1, 8.507059e+37 }
 0x5d6   :  { %v1304_v24 = vadd.f32 %v925_v21, %v648_v23 }
 0x5d8   :  { %876 = vmatmul.msk.f32.vlgmr.msra.gmra.mxu2 %vm37_vm0, %v1304_v24 }
 0x5d9   :  { %v971_v26 = vpop.eup %970 }
 0x5da   :  { %v633_v27 = vmul.f32 %v971_v26, %v616_v22  ;;  %vm638_vm4 = vweird.f32 %v971_v26 }
 0x5db   :  { %vm639_vm6 = vmor %vm637_vm5, %vm638_vm4 }
 0x5dc   :  { %v634_v6 = vsub.f32 1.0, %v633_v27 }
 0x5de   :  { %v635_v7 = vmul.f32 %v971_v26, %v634_v6 }
 0x5e0   :  { %v636_v0 = vadd.f32 %v971_v26, %v635_v7 }
 0x5e2   :  { %v640_v3 = vsel %vm639_vm6, %v971_v26, %v636_v0 }
 0x5e3   :  { %v645_v5 = vsel %vm642_vm7, %v644_v2, %v640_v3 }
 0x5e4   :  { %v646_v25 = vmul.f32 %v645_v5, %v1266_v4  ;;  %v709_v4 = vld [vmem:[%s1384_s2 + $0x40] sm:$0xff] }
 0x5e5   :  { %725 = vmatpush.msra.mxu3 %v709_v4 }
 0x5e6   :  { %v649_v31 = vmul.f32 %v924_v9, %v646_v25 }
 0x5e7   :  { %726 = vmatpush.msra.mxu3 %v708_v35 }
 0x5e8   :  { %v652_v32 = vadd.f32 %v925_v21, %v649_v31 }
 0x5e9   :  { %727 = vmatpush.msra.mxu3 %v707_v36 }
 0x5ea   :  { %877 = vmatmul.msk.f32.gmra.mxu2 %vm37_vm0, %v652_v32 }
 0x5eb   :  { %728 = vmatpush.msra.mxu3 %v706_v37 }
 0x5ed   :  { %729 = vmatpush.msra.mxu3 %v705_v38 }
 0x5ef   :  { %730 = vmatpush.msra.mxu3 %v704_v39 }
 0x5f1   :  { %731 = vmatpush.msra.mxu3 %v703_v40 }
 0x5f3   :  { %732 = vmatpush.msra.mxu3 %v702_v41 }
 0x5f5   :  { %733 = vmatpush.msra.mxu3 %v701_v42 }
 0x65b   :  { %v677_v44 = vpop.f32.mrf.mxu2 }
 0x65c   :  { %v678_v14 = vadd.f32 %v926_v43, %v677_v44 }
 0x65e   :  { %v685_v15 = vmul.f32 0.044715, %v678_v14  ;;  %v683_v51 = vmul.f32 0.5, %v678_v14 }
 0x660   :  { %v687_v45 = vmul.f32 %v685_v15, %v678_v14 }
 0x662   :  { %v689_v46 = vmul.f32 %v687_v45, %v678_v14 }
 0x664   :  { %v691_v47 = vadd.f32 %v689_v46, %v678_v14 }
 0x666   :  { %v693_v48 = vmul.f32 0.7978846, %v691_v47 }
 0x668   :  { %972 = vtanh.f32 %v693_v48 }
 0x66d   :  { %v680_v13 = vpop.f32.mrf.mxu2 }
 0x66e   :  { %v973_v16 = vpop.eup %972  ;;  %v681_v49 = vadd.f32 %v926_v43, %v680_v13 }
 0x66f   :  { %v697_v52 = vadd.f32 1.0, %v973_v16 }
 0x670   :  { %v686_v53 = vmul.f32 0.044715, %v681_v49  ;;  %v684_v59 = vmul.f32 0.5, %v681_v49 }
 0x671   :  { %v699_v17 = vmul.f32 %v697_v52, %v683_v51 }
 0x672   :  { %v688_v18 = vmul.f32 %v686_v53, %v681_v49  ;;  %v928_v53 = vld [vmem:[%s1385_s3 + $0x6] ss:$0 sm:$0xff] }
 0x673   :  { %734 = vmatmul.f32.vlgmr.msra.gmra.mxu3 %v699_v17 }
 0x674   :  { %v690_v54 = vmul.f32 %v688_v18, %v681_v49 }
 0x676   :  { %v692_v55 = vadd.f32 %v690_v54, %v681_v49 }
 0x678   :  { %v694_v56 = vmul.f32 0.7978846, %v692_v55 }
 0x67a   :  { %974 = vtanh.f32 %v694_v56  ;;  %v929_v56 = vld [vmem:[%s1385_s3 + $0x7] ss:$0 sm:$0xff]  ;;  %s1020_s3 = smov [#allocation2]  }
 0x67b   :  { %s834_s10 = sshll.u32 %s1020_s3, 4  ;;  %s835_s10 = int_to_ptr.vmem [resolvable:$true] %s834_s10 }
 0x680   :  { %v975_v57 = vpop.eup %974 }
 0x681   :  { %v698_v60 = vadd.f32 1.0, %v975_v57 }
 0x683   :  { %v700_v50 = vmul.f32 %v698_v60, %v684_v59 }
 0x685   :  { %737 = vmatmul.f32.gmra.mxu3 %v700_v50 }
 0x6f6   :  { %v735_v62 = vpop.f32.mrf.mxu3 }
 0x6f7   :  { %v736_v63 = vadd.f32 %v927_v61, %v735_v62 }
 0x6f9   :  { %v741_v8 = vadd.f32 %v736_v63, %v1304_v24 }
 0x6fb   :  { %v743_v9 = vsel %vm37_vm0, %v741_v8, 0.0 }
 0x6fc   :  { %744 = vadd.xlane.f32.xlu2 %v743_v9 }
 0x708   :  { %v738_v10 = vpop.f32.mrf.mxu3 }
 0x709   :  { %v739_v19 = vadd.f32 %v927_v61, %v738_v10 }
 0x70b   :  { %v742_v58 = vadd.f32 %v739_v19, %v652_v32 }
 0x70d   :  { %v746_v20 = vsel %vm37_vm0, %v742_v58, 0.0 }
 0x70e   :  { %747 = vadd.xlane.f32.xlu0 %v746_v20 }
 0x76f   :  { %v745_v21 = vpop.xlane.xlu2 %744 }
 0x770   :  { %v749_v22 = vmul.f32 %v745_v21, %v1257_v28 }
 0x772   :  { %v751_v23 = vsub.f32 %v741_v8, %v749_v22 }
 0x774   :  { %v753_v26 = vmul.f32 %v751_v23, %v751_v23 }
 0x776   :  { %v755_v27 = vsel %vm37_vm0, %v753_v26, 0.0 }
 0x777   :  { %756 = vadd.xlane.f32.xlu1 %v755_v27 }
 0x781   :  { %v748_v6 = vpop.xlane.xlu0 %747 }
 0x782   :  { %v750_v24 = vmul.f32 %v748_v6, %v1257_v28 }
 0x784   :  { %v1358_v30 = vsub.f32 %v742_v58, %v750_v24 }
 0x786   :  { %v754_v7 = vmul.f32 %v1358_v30, %v1358_v30 }
 0x788   :  { %v758_v1 = vsel %vm37_vm0, %v754_v7, 0.0 }
 0x789   :  { %759 = vadd.xlane.f32.xlu2 %v758_v1 }
 0x7ea   :  { %v757_v0 = vpop.xlane.xlu1 %756 }
 0x7eb   :  { %v761_v2 = vmul.f32 %v757_v0, %v1257_v28 }
 0x7ed   :  { %v763_v3 = vadd.f32 1e-05, %v761_v2 }
 0x7ef   :  { %976 = vrsqrt.f32 %v763_v3  ;;  %vm772_vm8 = vcmp.eq.f32.partialorder %v763_v3, inf  ;;  %v775_v37 = vand.u32 2147483648, %v763_v3  ;;  %vm774_vm9 = vcmp.eq.f32.partialorder %v763_v3, 0.0 }
 0x7f5   :  { %v977_v5 = vpop.eup %976 }
 0x7f6   :  { %v766_v25 = vmul.f32 %v977_v5, %v763_v3 }
 0x7f8   :  { %v767_v31 = vmul.f32 %v977_v5, %v766_v25 }
 0x7fa   :  { %v768_v32 = vmul.f32 0.5, %v767_v31 }
 0x7fc   :  { %v769_v33 = vsub.f32 1.5, %v768_v32  ;;  %v760_v34 = vpop.xlane.xlu2 %759 }
 0x7fd   :  { %v762_v29 = vmul.f32 %v760_v34, %v1257_v28 }
 0x7fe   :  { %v770_v4 = vmul.f32 %v977_v5, %v769_v33 }
 0x7ff   :  { %v764_v35 = vadd.f32 1e-05, %v762_v29 }
 0x800   :  { %v771_v36 = vmul.f32 %v770_v4, %v763_v3 }
 0x801   :  { %978 = vrsqrt.f32 %v764_v35  ;;  %vm784_vm13 = vcmp.eq.f32.partialorder %v764_v35, inf  ;;  %v787_v51 = vand.u32 2147483648, %v764_v35  ;;  %vm786_vm15 = vcmp.eq.f32.partialorder %v764_v35, 0.0 }
 0x802   :  { %v773_v38 = vsel %vm772_vm8, %v763_v3, %v771_v36 }
 0x803   :  { %v776_v39 = vsel %vm774_vm9, %v775_v37, %v773_v38 }
 0x804   :  { %980 = vrcp.f32 %v776_v39  ;;  %v800_v46 = vand.u32 2147483648, %v776_v39  ;;  %v798_v47 = vand.u32 2147483647, %v776_v39  ;;  %vm794_vm11 = vweird.f32 %v776_v39 }
 0x806   :  { %v801_v49 = vor.u32 1.1754944e-38, %v800_v46  ;;  %vm799_vm14 = vcmp.eq.f32.partialorder %v798_v47, 8.507059e+37 }
 0x807   :  { %v979_v40 = vpop.eup %978 }
 0x808   :  { %v778_v41 = vmul.f32 %v979_v40, %v764_v35 }
 0x80a   :  { %v981_v42 = vpop.eup %980  ;;  %v779_v43 = vmul.f32 %v979_v40, %v778_v41 }
 0x80b   :  { %v790_v44 = vmul.f32 %v981_v42, %v776_v39  ;;  %vm795_vm10 = vweird.f32 %v981_v42 }
 0x80c   :  { %v780_v14 = vmul.f32 0.5, %v779_v43  ;;  %vm796_vm12 = vmor %vm794_vm11, %vm795_vm10 }
 0x80d   :  { %v791_v15 = vsub.f32 1.0, %v790_v44 }
 0x80e   :  { %v781_v45 = vsub.f32 1.5, %v780_v14 }
 0x80f   :  { %v792_v28 = vmul.f32 %v981_v42, %v791_v15 }
 0x810   :  { %v782_v48 = vmul.f32 %v979_v40, %v781_v45 }
 0x811   :  { %v793_v13 = vadd.f32 %v981_v42, %v792_v28 }
 0x812   :  { %v783_v16 = vmul.f32 %v782_v48, %v764_v35 }
 0x813   :  { %v797_v52 = vsel %vm796_vm12, %v981_v42, %v793_v13 }
 0x814   :  { %v785_v17 = vsel %vm784_vm13, %v764_v35, %v783_v16  ;;  %v802_v18 = vsel %vm799_vm14, %v801_v49, %v797_v52 }
 0x815   :  { %v788_v54 = vsel %vm786_vm15, %v787_v51, %v785_v17  ;;  %v803_v55 = vmul.f32 %v802_v18, %v751_v23 }
 0x816   :  { %982 = vrcp.f32 %v788_v54  ;;  %v815_v63 = vand.u32 2147483648, %v788_v54  ;;  %v813_v9 = vand.u32 2147483647, %v788_v54  ;;  %vm809_vm3 = vweird.f32 %v788_v54 }
 0x817   :  { %v820_v57 = vmul.f32 %v928_v53, %v803_v55 }
 0x818   :  { %v816_v19 = vor.u32 1.1754944e-38, %v815_v63  ;;  %vm814_vm5 = vcmp.eq.f32.partialorder %v813_v9, 8.507059e+37 }
 0x819   :  { %v823_v59 = vadd.f32 %v929_v56, %v820_v57 }
 0x81b   :  { %v825_v60 = vsel %vm37_vm0, %v823_v59, %v1097_v12 }
 0x81c   :  { %v983_v50 = vpop.eup %982  ;;  %828 = vst.msk [vmem:[#allocation2] sm:$0xff] %vm827_vm1, %v825_v60 }
 0x81d   :  { %v805_v61 = vmul.f32 %v983_v50, %v788_v54  ;;  %vm810_vm2 = vweird.f32 %v983_v50 }
 0x81e   :  { %vm811_vm4 = vmor %vm809_vm3, %vm810_vm2 }
 0x81f   :  { %v806_v62 = vsub.f32 1.0, %v805_v61 }
 0x821   :  { %v807_v8 = vmul.f32 %v983_v50, %v806_v62 }
 0x823   :  { %v808_v10 = vadd.f32 %v983_v50, %v807_v8 }
 0x825   :  { %v812_v58 = vsel %vm811_vm4, %v983_v50, %v808_v10 }
 0x826   :  { %v817_v20 = vsel %vm814_vm5, %v816_v19, %v812_v58 }
 0x827   :  { %v818_v21 = vmul.f32 %v817_v20, %v1358_v30 }
 0x829   :  { %v821_v12 = vmul.f32 %v928_v53, %v818_v21 }
 0x82b   :  { %v824_v22 = vadd.f32 %v929_v56, %v821_v12 }
 0x82d   :  { %v826_v23 = vsel %vm37_vm0, %v824_v22, %v1092_v11 }
 0x82e   :  { %829 = vst.msk [vmem:[#allocation2 + $0x8] sm:$0xff] %vm827_vm1, %v826_v23 }
 0x82f   :  { %842 = dma.vmem_to_hbm [thread:$0]  %s835_s10, 256, %s837_s13, [#allocation3], %s1021_s14, %s1021_s14, %s1016_s8  }
 0x830   :  { %1008 = dma.done.wait [#allocation3], 256  }
 0x831   :  { %1009 = vsyncadd [#allocation3], 4294967040 }
 0x832   :  { %847 = vsyncpa [#allocation3], 1 }

</bundles_post_ra>
